<compile_context>
chip_gen: v7x
topology: tpu7x:2x2x1
jax: 0.10.0
libtpu: 0.0.40
codegen_flags: <defaults>
</compile_context>

<pallas_src>
import jax
import jax.numpy as jnp
from jax.experimental import pallas as pl
from jax.experimental.pallas import tpu as pltpu


def _cdiv(a, b):
    return -(-a // b)


def _round_up(a, m):
    return _cdiv(a, m) * m


def _make_kernel(use_selection, need_mask, xl, L):
    """Builds the fused conv1x1 + BN + residual + ReLU kernel body."""

    def _epilogue(y, shift_ref, res_ref, o_ref):
        y = y + shift_ref[...]                      # folded conv-bias + BN shift (f32)
        y = y + res_ref[...].astype(jnp.float32)    # residual branch
        o_ref[...] = jnp.maximum(y, 0.0).astype(o_ref.dtype)

    if not use_selection:
        def kernel(x_ref, w_ref, shift_ref, res_ref, o_ref):
            # x_ref: (C_in, tl), w_ref: (co, C_in), res/o: (co, tl)
            y = jnp.dot(w_ref[...], x_ref[...], preferred_element_type=jnp.float32)
            _epilogue(y, shift_ref, res_ref, o_ref)
    else:
        def kernel(x_ref, w_ref, shift_ref, sel_ref, res_ref, o_ref):
            x = x_ref[...]                          # (C_in, xl) unstrided block
            if need_mask:
                # Ragged tail tile: zero padded lanes so 0*garbage (possible NaN)
                # cannot contaminate valid columns of the selection matmul.
                j = pl.program_id(2)
                valid = L - j * xl
                col = jax.lax.broadcasted_iota(jnp.int32, x.shape, 1)
                x = jnp.where(col < valid, x, jnp.zeros_like(x))
            # Exact 0/1 column selection (stride fold): one nonzero per column.
            xs = jnp.dot(x, sel_ref[...])           # (C_in, tl)
            y = jnp.dot(w_ref[...], xs, preferred_element_type=jnp.float32)
            _epilogue(y, shift_ref, res_ref, o_ref)

    return kernel


def shortcut_layer(input_tensor, out_tensor, weight, bias, gamma, beta,
                   running_mean, running_var, *, stride=1, eps=1e-5):
    """relu(out_tensor + BatchNorm1d(Conv1d_k1(input_tensor))), NCL layout.

    input_tensor : (N, C_in, L)
    out_tensor   : (N, C_out, L_out), L_out = ceil(L / stride)
    weight       : (C_out, C_in)   Conv1d kernel_size=1 weight (squeezed)
    bias         : (C_out,) or None
    gamma, beta, running_mean, running_var : (C_out,)  BatchNorm1d params
    """
    N, C_in, L = input_tensor.shape
    C_out = weight.shape[0]
    L_out = _cdiv(L, stride)
    assert out_tensor.shape == (N, C_out, L_out)

    f32 = jnp.float32
    x = input_tensor

    # ---- fold conv bias + BN (running stats) into scale / shift, in f32 ----
    inv_std = jax.lax.rsqrt(running_var.astype(f32) + jnp.asarray(eps, f32))
    scale = gamma.astype(f32) * inv_std
    b = bias.astype(f32) if bias is not None else jnp.zeros((C_out,), f32)
    shift = beta.astype(f32) + (b - running_mean.astype(f32)) * scale
    w_scaled = (weight.astype(f32) * scale[:, None]).astype(x.dtype)   # (C_out, C_in)
    shift2d = shift.reshape(C_out, 1)                                  # (C_out, 1) f32

    xbytes = x.dtype.itemsize
    obytes = out_tensor.dtype.itemsize
    wbytes = w_scaled.dtype.itemsize

    # ---- per-generation VMEM budget (v5e/v6e: 128 MiB, v7x: 64 MiB per core) ----
    try:
        vmem_cap = int(pltpu.get_tpu_info().vmem_capacity_bytes)
    except Exception:
        vmem_cap = 64 * 1024 * 1024                 # conservative (v7x-like) fallback
    vmem_limit = int(min((vmem_cap * 3) // 4, 64 * 1024 * 1024))

    # ---- C_out tiling so the (double-buffered) weight stays bounded ----
    w_budget = 12 * 1024 * 1024
    if C_out <= 8 or 2 * C_out * C_in * wbytes <= w_budget:
        co = C_out
    else:
        co = max(8, (w_budget // (2 * C_in * wbytes)) // 8 * 8)
        co = min(co, C_out)
    n_co = _cdiv(C_out, co)
    # W + shift are allocated double-buffered by the pipeline even though their
    # constant index_map means they are only re-DMA'd when the C_out tile changes.
    w_resident = 2 * co * (C_in * wbytes + 4)

    # ---- length tile: lane-dense, balanced, VMEM-budgeted (incl. the weight) ----
    if L_out <= 128:
        tl = L_out
    else:
        stream_budget = max(4 * 1024 * 1024,
                            min(24 * 1024 * 1024,
                                vmem_limit - w_resident - 8 * 1024 * 1024))
        per_col = 2 * (C_in * stride * xbytes + 2 * co * obytes)      # x + res + out (double-buffered)
        tl_max = (stream_budget // per_col) // 128 * 128
        tl_max = int(max(128, min(tl_max, 2048 if stride == 1 else 512)))
        # Balance tiles so the tail tile is not nearly empty.
        tl = _round_up(_cdiv(L_out, _cdiv(L_out, tl_max)), 128)
        # v7x has 2 TensorCores: make sure there are >= 2 parallel grid steps.
        if N * n_co * _cdiv(L_out, tl) < 2 and L_out >= 256:
            tl = _round_up(_cdiv(L_out, 2), 128)
    n_l = _cdiv(L_out, tl)
    grid = (N, n_co, n_l)

    # ---- stride fold: unstrided x blocks + exact 0/1 selection matrix ----
    if stride == 1:
        xl, sel, need_mask = tl, None, False
    else:
        xl = L if n_l == 1 else tl * stride          # multiple of 128 (or full L)
        need_mask = (n_l * xl != L)
        rows = jax.lax.broadcasted_iota(jnp.int32, (xl, tl), 0)
        cols = jax.lax.broadcasted_iota(jnp.int32, (xl, tl), 1)
        sel = (rows == cols * stride).astype(x.dtype)  # (xl, tl), S[t*stride, t] = 1

    x_spec = pl.BlockSpec((None, C_in, xl), lambda n, c, j: (n, 0, j))
    w_spec = pl.BlockSpec((co, C_in), lambda n, c, j: (c, 0))
    sh_spec = pl.BlockSpec((co, 1), lambda n, c, j: (c, 0))
    res_spec = pl.BlockSpec((None, co, tl), lambda n, c, j: (n, c, j))
    out_spec = pl.BlockSpec((None, co, tl), lambda n, c, j: (n, c, j))

    if stride == 1:
        in_specs = [x_spec, w_spec, sh_spec, res_spec]
        args = (x, w_scaled, shift2d, out_tensor)
    else:
        sel_spec = pl.BlockSpec((xl, tl), lambda n, c, j: (0, 0))
        in_specs = [x_spec, w_spec, sh_spec, sel_spec, res_spec]
        args = (x, w_scaled, shift2d, sel, out_tensor)

    flops = 2 * N * C_out * C_in * L_out
    if stride > 1:
        flops += 2 * N * n_co * n_l * C_in * xl * tl      # selection matmul
    bytes_accessed = (N * n_co * C_in * (L if stride > 1 else L_out) * xbytes
                      + 2 * N * C_out * L_out * obytes
                      + N * n_co * co * C_in * wbytes)
    cost = pl.CostEstimate(flops=int(flops), transcendentals=0,
                           bytes_accessed=int(bytes_accessed))

    kernel = _make_kernel(stride > 1, need_mask, xl, L)

    out = pl.pallas_call(
        kernel,
        out_shape=jax.ShapeDtypeStruct((N, C_out, L_out), out_tensor.dtype),
        grid=grid,
        in_specs=in_specs,
        out_specs=out_spec,
        # Residual aliases the output: with a donating caller this is in-place
        # and removes a full-size extra HBM allocation.
        input_output_aliases={len(in_specs) - 1: 0},
        compiler_params=pltpu.CompilerParams(
            dimension_semantics=("parallel", "parallel", "parallel"),
            vmem_limit_bytes=vmem_limit,
        ),
        cost_estimate=cost,
    )(*args)
    return out


if __name__ == "__main__":
    key = jax.random.PRNGKey(0)
    eps = 1e-5

    def reference(input_tensor, out_tensor, weight, bias, gamma, beta,
                  running_mean, running_var, stride):
        xs = input_tensor[:, :, ::stride].astype(jnp.float32)
        conv = jnp.einsum("oc,ncl->nol", weight, xs) + bias[None, :, None]
        bn = (gamma[None, :, None] * (conv - running_mean[None, :, None])
              / jnp.sqrt(running_var[None, :, None] + eps) + beta[None, :, None])
        return jnp.maximum(out_tensor.astype(jnp.float32) + bn, 0.0)

    configs = [
        # (N, C_in, C_out, L, stride, dtype, tol)
        (2, 4, 8, 16, 2, jnp.float32, 1e-4),      # tiny, stride-2, single full block
        (2, 4, 8, 272, 1, jnp.float32, 1e-4),     # stride-1, partial 128-lane tile
        (2, 6, 8, 1090, 2, jnp.float32, 1e-4),    # stride-2, multi-tile + ragged tail mask
        (2, 8, 8, 272, 1, jnp.bfloat16, 5e-2),    # bf16 streaming mode
    ]
    for (N, C_in, C_out, L, stride, dtype, tol) in configs:
        L_out = -(-L // stride)
        key, *ks = jax.random.split(key, 9)
        input_tensor = jax.random.normal(ks[0], (N, C_in, L), jnp.float32).astype(dtype)
        out_tensor = jax.random.normal(ks[1], (N, C_out, L_out), jnp.float32).astype(dtype)
        weight = jax.random.normal(ks[2], (C_out, C_in), jnp.float32) * 0.1
        bias = jax.random.normal(ks[3], (C_out,), jnp.float32) * 0.1
        gamma = 1.0 + 0.1 * jax.random.normal(ks[4], (C_out,), jnp.float32)
        beta = 0.1 * jax.random.normal(ks[5], (C_out,), jnp.float32)
        running_mean = 0.1 * jax.random.normal(ks[6], (C_out,), jnp.float32)
        running_var = jnp.abs(1.0 + 0.1 * jax.random.normal(ks[7], (C_out,), jnp.float32))

        y = shortcut_layer(input_tensor, out_tensor, weight, bias, gamma, beta,
                           running_mean, running_var, stride=stride, eps=eps)
        jax.block_until_ready(y)

        ref = reference(input_tensor, out_tensor, weight, bias, gamma, beta,
                        running_mean, running_var, stride)
        assert y.shape == ref.shape and y.dtype == dtype
        assert jnp.allclose(y.astype(jnp.float32), ref, atol=tol, rtol=tol), \
            f"mismatch vs reference for config {(N, C_in, C_out, L, stride, dtype)}"

    print("KERNEL_OK")
</pallas_src>

<mosaic_0001>
module attributes {stable_mosaic.version = 11 : i64} {
  func.func @kernel(%arg0: i32, %arg1: i32, %arg2: i32, %arg3: memref<1x4x16xf32, #tpu.memory_space<vmem>>, %arg4: memref<8x4xf32, #tpu.memory_space<vmem>>, %arg5: memref<8x1xf32, #tpu.memory_space<vmem>>, %arg6: memref<16x8xf32, #tpu.memory_space<vmem>>, %arg7: memref<1x8x8xf32, #tpu.memory_space<vmem>>, %arg8: memref<1x8x8xf32, #tpu.memory_space<vmem>>) attributes {dimension_semantics = [#tpu.dimension_semantics<parallel>, #tpu.dimension_semantics<parallel>, #tpu.dimension_semantics<parallel>], iteration_bounds = array<i64: 2, 1, 1>, scalar_prefetch = 0 : i64, scratch_operands = 0 : i64, tpu.core_type = #tpu.core_type<tc>, window_params = [{transform_indices = @transform_0, window_bounds = array<i64: 1, 4, 16>}, {transform_indices = @transform_1, window_bounds = array<i64: 8, 4>}, {transform_indices = @transform_2, window_bounds = array<i64: 8, 1>}, {pipeline_mode = #tpu.pipeline_mode<synchronous>, transform_indices = @transform_3, window_bounds = array<i64: 16, 8>}, {transform_indices = @transform_4, window_bounds = array<i64: 1, 8, 8>}, {transform_indices = @transform_5, window_bounds = array<i64: 1, 8, 8>}]} {
    %c0 = arith.constant 0 : index
    %c0_0 = arith.constant 0 : index
    %c0_1 = arith.constant 0 : index
    %0 = vector.load %arg3[%c0, %c0_0, %c0_1] : memref<1x4x16xf32, #tpu.memory_space<vmem>>, vector<1x4x16xf32>
    %1 = vector.shape_cast %0 : vector<1x4x16xf32> to vector<4x16xf32>
    %c0_2 = arith.constant 0 : index
    %c0_3 = arith.constant 0 : index
    %2 = vector.load %arg6[%c0_2, %c0_3] : memref<16x8xf32, #tpu.memory_space<vmem>>, vector<16x8xf32>
    %cst = arith.constant dense<0.000000e+00> : vector<4x8xf32>
    %3 = tpu.matmul %1, %2, %cst {dimension_numbers = #tpu.dot_dimension_numbers<[1], [0], [0], [1], [0, 0, 1, 1], [], []>} : vector<4x16xf32>, vector<16x8xf32>, vector<4x8xf32> -> vector<4x8xf32>
    %c0_4 = arith.constant 0 : index
    %c0_5 = arith.constant 0 : index
    %4 = vector.load %arg4[%c0_4, %c0_5] : memref<8x4xf32, #tpu.memory_space<vmem>>, vector<8x4xf32>
    %cst_6 = arith.constant dense<0.000000e+00> : vector<8x8xf32>
    %5 = tpu.matmul %4, %3, %cst_6 {dimension_numbers = #tpu.dot_dimension_numbers<[1], [0], [0], [1], [0, 0, 1, 1], [], []>} : vector<8x4xf32>, vector<4x8xf32>, vector<8x8xf32> -> vector<8x8xf32>
    %c0_7 = arith.constant 0 : index
    %c0_8 = arith.constant 0 : index
    %6 = vector.load %arg5[%c0_7, %c0_8] : memref<8x1xf32, #tpu.memory_space<vmem>>, vector<8x1xf32>
    %7 = vector.broadcast %6 : vector<8x1xf32> to vector<8x8xf32>
    %8 = arith.addf %5, %7 : vector<8x8xf32>
    %c0_9 = arith.constant 0 : index
    %c0_10 = arith.constant 0 : index
    %c0_11 = arith.constant 0 : index
    %9 = vector.load %arg7[%c0_9, %c0_10, %c0_11] : memref<1x8x8xf32, #tpu.memory_space<vmem>>, vector<1x8x8xf32>
    %10 = vector.shape_cast %9 : vector<1x8x8xf32> to vector<8x8xf32>
    %11 = arith.addf %8, %10 : vector<8x8xf32>
    %cst_12 = arith.constant 0.000000e+00 : f32
    %12 = vector.broadcast %cst_12 : f32 to vector<8x8xf32>
    %13 = arith.maximumf %11, %12 : vector<8x8xf32>
    %c0_13 = arith.constant 0 : index
    %c0_14 = arith.constant 0 : index
    %c0_15 = arith.constant 0 : index
    %14 = vector.load %arg8[%c0_13, %c0_14, %c0_15] : memref<1x8x8xf32, #tpu.memory_space<vmem>>, vector<1x8x8xf32>
    %15 = vector.shape_cast %14 : vector<1x8x8xf32> to vector<8x8xf32>
    %16 = vector.shape_cast %13 : vector<8x8xf32> to vector<1x8x8xf32>
    tpu.vector_store %arg8[%c0_13, %c0_14, %c0_15], %16 {strides = array<i32>} : memref<1x8x8xf32, #tpu.memory_space<vmem>>, vector<1x8x8xf32>,
    return
  }
  func.func @transform_0(%arg0: i32, %arg1: i32, %arg2: i32) -> (i32, i32, i32) {
    %c0_i32 = arith.constant 0 : i32
    %c0_i32_0 = arith.constant 0 : i32
    return %arg0, %c0_i32, %arg2 : i32, i32, i32
  }
  func.func @transform_1(%arg0: i32, %arg1: i32, %arg2: i32) -> (i32, i32) {
    %c0_i32 = arith.constant 0 : i32
    %c0_i32_0 = arith.constant 0 : i32
    return %arg1, %c0_i32 : i32, i32
  }
  func.func @transform_2(%arg0: i32, %arg1: i32, %arg2: i32) -> (i32, i32) {
    %c0_i32 = arith.constant 0 : i32
    %c0_i32_0 = arith.constant 0 : i32
    return %arg1, %c0_i32 : i32, i32
  }
  func.func @transform_3(%arg0: i32, %arg1: i32, %arg2: i32) -> (i32, i32) {
    %c0_i32 = arith.constant 0 : i32
    %c0_i32_0 = arith.constant 0 : i32
    %c0_i32_1 = arith.constant 0 : i32
    return %c0_i32, %c0_i32_0 : i32, i32
  }
  func.func @transform_4(%arg0: i32, %arg1: i32, %arg2: i32) -> (i32, i32, i32) {
    %c0_i32 = arith.constant 0 : i32
    return %arg0, %arg1, %arg2 : i32, i32, i32
  }
  func.func @transform_5(%arg0: i32, %arg1: i32, %arg2: i32) -> (i32, i32, i32) {
    %c0_i32 = arith.constant 0 : i32
    return %arg0, %arg1, %arg2 : i32, i32, i32
  }
}

</mosaic_0001>

<bundles_post_ra>
// kernel: tpu_custom_call.1
= control target key start
LH: loop header
LB: loop body
LE: loop exit
PB: predicated region body
PF: predicated region fallthrough
CT: control target
= control target key end

     0   :  { %10 = vsyncpa [#allocation3], 0  ;;  %s1096_s0 = inlined_call_operand.vmem [shape: f32[2,4,16], index: 0, kind: input, shape index: {}]   ;;  %s1097_s1 = inlined_call_operand.vmem [shape: f32[8,4], index: 1, kind: input, shape index: {}]   ;;  %s1098_s2 = inlined_call_operand.vmem [shape: f32[8,1], index: 2, kind: input, shape index: {}]   ;;  %s1099_s3 = inlined_call_operand.vmem [shape: f32[16,8], index: 3, kind: input, shape index: {}]   ;;  %s1100_s4 = inlined_call_operand.hbm [shape: f32[2,8,8], index: 4, kind: input, shape index: {}, may-alias: {4,5}]   ;;  %s1101_s5 = inlined_call_operand.hbm [shape: f32[2,8,8], index: 5, kind: output, shape index: {}, may-alias: {4,5}]  }
   0x1   :  { %12 = vsyncpa [#allocation3 + $0x1], 0 }
   0x2   :  { %13 = vsyncpa [#allocation4], 0 }
   0x3   :  { %15 = vsyncpa [#allocation4 + $0x1], 0  ;;  %s900_s18 = smov 0   ;;  %s902_s19 = smov 0  }
   0x4   :  { %s904_s20 = smov 0   ;;  %s906_s21 = smov 0  }
   0x5   :  { %s908_s22 = smov 0   ;;  %s910_s23 = smov 0  }
   0x6 LB: > { %s644_s24 = sadd.s32 4294967295, %s862_s23   ;;  %s645_s25 = sadd.s32 4294967294, %s862_s23   ;;  %s862_s23 = sphi %s910_s23, %s21_s23   ;;  %s858_s22 = sphi %s908_s22, %s1117_s22   ;;  %s854_s21 = sphi %s906_s21, %s1116_s21   ;;  %s850_s20 = sphi %s904_s20, %s1115_s20   ;;  %s846_s19 = sphi %s902_s19, %s1114_s19   ;;  %s842_s18 = sphi %s900_s18, %s1113_s18  }
   0x7   : > { %s40_s26 = sadd.s32 1, %s858_s22  ;;  %s152_s27 = sadd.s32 1, %s850_s20 }
   0x8   : > { %p42_p0 = scmp.ge.s32.totalorder %s40_s26, 2  ;;  %p159_p1 = scmp.ne.s32.totalorder %s850_s20, %s846_s19 }
   0x9   : > { %p160_p2 = scmp.eq.s32.totalorder %s862_s23, 0  ;;  %p165_p3 = scmp.ne.s32.totalorder %s846_s19, %s842_s18 }
   0xa   : > { %s1119_s26 = smov (%p42_p0, %s40_s26), 0  ;;  %p166_p5 = scmp.eq.s32.totalorder %s644_s24, 0 }
   0xb   : > { %p941_p4 = por %p160_p2, %p159_p1  ;;  %s145_s29 = ssub.s32 %s858_s22, %s1119_s26 }
   0xc   : > { %p193_p6 = scmp.eq.s32.totalorder %s644_s24, 1  ;;  %p150_p7 = scmp.eq.s32.totalorder %s145_s29, 0 }
   0xd   : > { %p947_p8 = por %p166_p5, %p165_p3  ;;  %p199_p10 = scmp.eq.s32.totalorder %s645_s25, 1 }
   0xe   : > { %p951_p9 = por %p193_p6, %p159_p1  ;;  %p695_p13 = scmp.lt.s32.totalorder %s862_s23, 2 }
   0xf   : > { %s956_s7 = scalar_select %p150_p7, %s850_s20, %s152_s27  }
  0x10   : > { %s1105_s6 = scalar_select %p951_p9, 1, 0 }
  0x11   : > { %p958_p11 = por %p199_p10, %p165_p3  ;;  %s246_s9 = sand.u32 1, %s850_s20  }
  0x12   : > { %s650_s10 = sshll.u32 %s246_s9, 3  ;;  %s651_s11 = sshll.u32 %s858_s22, 7 }
  0x13   : > { %s1106_s8 = scalar_select %p958_p11, 1, 0 }
  0x14   : > { %s969_s14 = scalar_lea.hbm %s1100_s4, %s651_s11  ;;  %s250_s15 = scalar_lea.vmem [#allocation2], %s650_s10 }
  0x15   : > { %s259_s16 = sshll.u32 %s250_s15, 4  ;;  %p975_p0 = pnand %p695_p13, %p941_p4  ;;  %s971_s16 = int_to_ptr.vmem [resolvable:$true] %s259_s16 }
  0x16   : > { %s247_s24 = scalar_lea.sflag [#allocation3], %s246_s9  ;;  %s750_s25 = scalar_lea.hbm %s969_s14, 128 }
  0x17   : > { %p751_p3 = scmp.ne.s32.totalorder %s969_s14, %s750_s25  ;;  %p752_p5 = pneg %p975_p0 }
  0x18   : > { %s755_s28 = scalar_lea.hbm %s1100_s4, 256  ;;  %p756_p4 = scmp.lt.u32.totalorder %s969_s14, %s1100_s4 }
  0x19   : > { %p753_p6 = pnand %p752_p5, %p751_p3  ;;  %p757_p10 = scmp.lt.u32.totalorder %s755_s28, %s750_s25 }
  0x1a   : > { %p759_p12 = scmp.lt.u32.totalorder %s750_s25, %s969_s14 }
  0x1b   : > { %p754_p7 = pneg %p753_p6  ;;  %p758_p13 = por %p757_p10, %p756_p4 }
  0x1d   : > { %p760_p1 = por %p759_p12, %p758_p13 }
  0x1f   : > { %p761_p2 = pnand %p760_p1, %p754_p7 }
  0x21   : > { %764 = shalt.err (!%p761_p2)
}
  0x22   : > { %s765_s9 = scalar_lea.vmem %s971_s16, 128  ;;  %s864_s12 = smov [#allocation2]  }
  0x23   : > { %p766_p3 = scmp.ne.s32.totalorder %s971_s16, %s765_s9  ;;  %s770_s13 = sshll.u32 %s864_s12, 4  ;;  %s771_s13 = int_to_ptr.vmem [resolvable:$false] %s770_s13 }
  0x24   : > { %s772_s15 = scalar_lea.vmem %s771_s13, 256  ;;  %p773_p9 = scmp.lt.s32.totalorder %s971_s16, %s771_s13 }
  0x25   : > { %p768_p6 = pnand %p766_p3, %p752_p5  ;;  %p774_p4 = scmp.lt.s32.totalorder %s772_s15, %s765_s9 }
  0x27   : > { %p769_p11 = pneg %p768_p6  ;;  %p775_p10 = por %p774_p4, %p773_p9 }
  0x29   : > { %p776_p12 = pnand %p775_p10, %p769_p11 }
  0x2b   : > { %779 = shalt.err (!%p776_p12)
}
  0x2c   : > { %690 = dma.hbm_to_vmem [thread:$0]  (!%p975_p0), %s969_s14, 128, %s971_s16, %s247_s24  }
  0x2d   : > { %p1108_p1 = scmp.lt.s32.totalorder %s862_s23, 3  ;;  %p1109_p2 = scmp.ge.s32.totalorder %s862_s23, 1 }
  0x2f   : > { %p265_p5 = pnand %p1109_p2, %p1108_p1 }
  0x30   : > { %s1011_s25 = sand.u32 (!%p265_p5), 1, %s846_s19  }
  0x31   : > { %268 = sbr.rel (%p265_p5) target bundleno = 509 (0x1fd), region = 40  ;;  %s653_s27 = sshll.u32 (!%p265_p5), %s1011_s25, 3 }
  0x32   : > { %s271_s29 = scalar_lea.sflag (!%p265_p5), [#allocation3], %s1011_s25  ;;  %s1017_s17 = scalar_lea.vmem (!%p265_p5), [#allocation2], %s653_s27 }
  0x38   : > { %833 = dma.done.wait (%p947_p8), %s271_s29, 128  }
  0x39   : > { %835 = vsyncadd (%p947_p8), %s271_s29, 4294967168  ;;  %p316_p9 = scmp.lt.s32.totalorder %s854_s21, 1  ;;  %v865_v0 = vmov 0.0|0.0   ;;  %vm866_vm0 = vmmov 0   ;;  %v867_v1 = vmov 0.0   ;;  %v332_v2 = vld [vmem:[%s1099_s3] sm:$0xff] }
  0x3a   : > { %680 = vmatprep.subr.bf16.mxu0 %v865_v0  ;;  %672 = vmatprep.mubr.msk.f32.mxu0 %vm866_vm0, %v867_v1  ;;  %v333_v3 = vld [vmem:[%s1099_s3 + $0x8] sm:$0xff]  ;;  %vm334_vm1 = vcmask 130048   ;;  %v409_v6 = vld [vmem:[%s1098_s2] sm:$0xff]  ;;  %v868_v7 = vmov 0   ;;  %vm419_vm2 = vcmask 1043456   ;;  %vm415_vm3 = vcmask 31744  }
  0x3b   : > { %s317_s14 = scalar_select %p316_p9, %s854_s21, 1  ;;  %675 = vmatprep.subr.mxu1 %v867_v1  ;;  %677 = vmatprep.mubr.msk.f32.mxu1 %vm866_vm0, %v867_v1  ;;  %v681_v4 = vpack.c.bf16 %v333_v3, %v332_v2  ;;  %v408_v8 = vld [vmem:[%s1097_s1] sm:$0xff]  ;;  %vm496_vm4 = vcmask 64512  }
  0x3c   : > { %749 = vset.pattern.permute.xlu0 %v868_v7  ;;  %v493_v13 = vld [vmem:[%s1017_s17] sm:$0xff]  ;;  %s315_s24 = scalar_lea.vmem [#allocation5], %s653_s27  ;;  %s499_s17 = scalar_lea.sflag [#allocation4], %s1011_s25 }
  0x3d   : > { %s655_s16 = sshll.u32 %s317_s14, 2  ;;  %682 = vmatpush3.bf16.msra.mxu0 %v681_v4  ;;  %412 = vperm.xlu0 %749, %v409_v6   ;;  %s514_s28 = sshll.u32 %s315_s24, 4  ;;  %s1049_s28 = int_to_ptr.vmem [resolvable:$true] %s514_s28 }
  0x3e   : > { %s322_s12 = scalar_lea.vmem %s1096_s0, %s655_s16  ;;  %s660_s16 = sshll.u32 %s854_s21, 7 }
  0x3f   : > { %v331_v5 = vld [vmem:[%s322_s12] sm:$0xf]  ;;  %s1047_s30 = scalar_lea.hbm %s1101_s5, %s660_s16  ;;  %s780_s9 = scalar_lea.vmem %s1049_s28, 128 }
  0x40   : > { %673 = vmatmul.mubr.msk.f32.vlgmr.msra.gmra.mrb[0].mxu0 %vm334_vm1, %v331_v5  ;;  %p781_p8 = scmp.ne.s32.totalorder %s1049_s28, %s780_s9  ;;  %p1110_p11 = scmp.ne.s32.totalorder %s1105_s6, 0 }
  0x41   : > { %s869_s21 = smov [#allocation5]  }
  0x42   : > { %p782_p0 = pnand %p781_p8, %p1110_p11  ;;  %s784_s27 = sshll.u32 %s869_s21, 4  ;;  %s785_s27 = int_to_ptr.vmem [resolvable:$false] %s784_s27 }
  0x43   : > { %s786_s12 = scalar_lea.vmem %s785_s27, 256  ;;  %p787_p13 = scmp.lt.s32.totalorder %s1049_s28, %s785_s27 }
  0x44   : > { %p783_p7 = pneg %p782_p0  ;;  %p788_p3 = scmp.lt.s32.totalorder %s786_s12, %s780_s9 }
  0x46   : > { %p789_p6 = por %p788_p3, %p787_p13 }
  0x48   : > { %p790_p4 = pnand %p789_p6, %p783_p7 }
  0xbc   : > { %v413_v11 = vpop.permute.xlu0 %412 }
 0x113   : > { %v404_v9 = vpop.f32.mrb[0].mxu0 }
 0x114   : > { %v674_v10 = vpop.f32.mrb[1].mxu0  ;;  %676 = vmatpush3.msk.msra.mxu1 %vm419_vm2, %v404_v9 }
 0x115   : > { %678 = vmatmul.mubr.msk.f32.vlgmr.msra.gmra.mrb[0].mxu1 %vm415_vm3, %v408_v8 }
 0x1e8   : > { %v489_v12 = vpop.f32.mrb[0].mxu1 }
 0x1e9   : > { %v490_v14 = vadd.f32 %v489_v12, %v413_v11  ;;  %v679_v15 = vpop.f32.mrb[1].mxu1 }
 0x1eb   : > { %v494_v16 = vadd.f32 %v493_v13, %v490_v14 }
 0x1ed   : > { %v495_v17 = vmax.f32 %v494_v16, 0.0 }
 0x1ef   : > { %497 = vst.msk [vmem:[%s315_s24] sm:$0xff] %vm496_vm4, %v495_v17 }
 0x1f0   : > { %793 = shalt.err (!%p790_p4)
}
 0x1f1   : > { %s794_s25 = scalar_lea.hbm %s1047_s30, 128  ;;  %s798_s29 = scalar_lea.hbm %s1101_s5, 256 }
 0x1f2   : > { %p795_p10 = scmp.ne.s32.totalorder %s1047_s30, %s794_s25  ;;  %p799_p2 = scmp.lt.u32.totalorder %s1047_s30, %s1101_s5 }
 0x1f3   : > { %p800_p5 = scmp.lt.u32.totalorder %s798_s29, %s794_s25  ;;  %p802_p8 = scmp.lt.u32.totalorder %s794_s25, %s1047_s30 }
 0x1f4   : > { %p796_p12 = pnand %p795_p10, %p1110_p11 }
 0x1f5   : > { %p801_p9 = por %p800_p5, %p799_p2 }
 0x1f6   : > { %p797_p1 = pneg %p796_p12 }
 0x1f7   : > { %p803_p0 = por %p802_p8, %p801_p9 }
 0x1f9   : > { %p804_p7 = pnand %p803_p0, %p797_p1 }
 0x1fb   : > { %807 = shalt.err (!%p804_p7)
}
 0x1fc   : > { %685 = dma.vmem_to_hbm [thread:$0]  (%p1110_p11), %s1049_s28, 128, %s1047_s30, %s499_s17  }
 0x1fd PF: > { %s526_s24 = sand.u32 1, %s842_s18   ;;  %p1111_p13 = scmp.ne.s32.totalorder %s1106_s8, 0 }
 0x1fe   : > { %p1112_p3 = scmp.ge.s32.totalorder %s862_s23, 2  ;;  %s527_s10 = scalar_lea.sflag [#allocation4], %s526_s24 }
 0x200   : > { %p692_p6 = pnand %p1112_p3, %p1111_p13 }
 0x202   : > { %837 = dma.done.wait (!%p692_p6), %s527_s10, 128  }
 0x203   : > { %839 = vsyncadd (!%p692_p6), %s527_s10, 4294967168  ;;  %s21_s23 = sadd.s32 1, %s862_s23   ;;  %s1113_s18 = smov %s846_s19 }
 0x204   : > { %p18_p4 = scmp.ge.s32.totalorder %s21_s23, 4   ;;  %s1114_s19 = smov %s850_s20 }
 0x205   : > { %s1115_s20 = smov %s956_s7  ;;  %s1116_s21 = smov %s858_s22 }
 0x206   : > { %s1117_s22 = smov %s1119_s26  ;;  %20 = sbr.rel (!%p18_p4) target bundleno = 6 (0x6), region = 94 }
 0x20d   :  { %532 = vsyncpa [#allocation3], 1 }
 0x20e   :  { %534 = vsyncpa [#allocation3 + $0x1], 1 }
 0x20f   :  { %535 = vsyncpa [#allocation4], 1 }
 0x210   :  { %537 = vsyncpa [#allocation4 + $0x1], 1 }

</bundles_post_ra>
